<compile_context>
chip_gen: v6e
topology: v6e:2x2x1
jax: 0.10.0
libtpu: 0.0.40
codegen_flags: <defaults>
</compile_context>

<pallas_src>
import functools

import jax
import jax.numpy as jnp
from jax import lax
from jax.experimental import pallas as pl
from jax.experimental.pallas import tpu as pltpu


# ----------------------------- kernels --------------------------------------


def _stats_kernel(x_ref, gamma_ref, beta_ref, mm_ref, mv_ref,
                  scale_ref, shift_ref, new_mm_ref, new_mv_ref,
                  sum_ref, sumsq_ref, *, eps, momentum, count):
    """Accumulate per-channel sum / sumsq; finalize scale/shift + moving stats."""
    n = pl.program_id(0)
    h = pl.program_id(1)
    is_first = (n == 0) & (h == 0)
    is_last = ((n == pl.num_programs(0) - 1) & (h == pl.num_programs(1) - 1))

    @pl.when(is_first)
    def _():
        sum_ref[...] = jnp.zeros_like(sum_ref)
        sumsq_ref[...] = jnp.zeros_like(sumsq_ref)

    x = x_ref[0].astype(jnp.float32)                         # (C, t_hw)
    sum_ref[...] += jnp.sum(x, axis=-1, keepdims=True)       # (C, 1)
    sumsq_ref[...] += jnp.sum(x * x, axis=-1, keepdims=True)

    @pl.when(is_last)
    def _():
        inv_count = 1.0 / count
        mean = sum_ref[...] * inv_count                      # (C, 1)
        # One-pass variance, clamped at 0 against cancellation.
        var = jnp.maximum(sumsq_ref[...] * inv_count - mean * mean, 0.0)
        inv_std = lax.rsqrt(var + eps)                       # EUP, cheap
        gamma = gamma_ref[...].astype(jnp.float32)
        beta = beta_ref[...].astype(jnp.float32)
        scale = gamma * inv_std
        shift = beta - mean * scale
        scale_ref[...] = scale
        shift_ref[...] = shift
        # d2l convention: new = momentum*old + (1-momentum)*batch_stat.
        new_mm_ref[...] = (momentum * mm_ref[...].astype(jnp.float32)
                           + (1.0 - momentum) * mean).astype(new_mm_ref.dtype)
        new_mv_ref[...] = (momentum * mv_ref[...].astype(jnp.float32)
                           + (1.0 - momentum) * var).astype(new_mv_ref.dtype)


def _normalize_kernel(x_ref, scale_ref, shift_ref, y_ref):
    """y = x * scale + shift, per-channel scale/shift broadcast over lanes."""
    x = x_ref[0].astype(jnp.float32)                         # (C, t_hw)
    y = x * scale_ref[...] + shift_ref[...]
    y_ref[0] = y.astype(y_ref.dtype)


# ----------------------------- wrapper ---------------------------------------


def _pick_hw_tile(hw, c, itemsize, max_bytes=2 << 20):
    """Largest multiple of 128 dividing hw with c*t*itemsize <= max_bytes."""
    if hw % 128 != 0:
        # Full-extent block (allowed by BlockSpec rules for non-tiled dims).
        return hw
    max_t = max(128, (max_bytes // max(c * itemsize, 1)) // 128 * 128)
    t = min(hw, max_t)
    while hw % t != 0:
        t -= 128
    return t


def batch_norm_pallas(x_nchw, gamma, beta, moving_mean, moving_var,
                      eps=1e-5, momentum=0.9, training=True):
    """Batch norm for 4-D NCHW input. Returns (Y, new_moving_mean, new_moving_var)."""
    # TODO(synk): 2-D (fully-connected, num_dims=2) input path not implemented;
    #             only the 4-D NCHW branch of the reference is covered here.
    N, C, H, W = x_nchw.shape
    HW = H * W
    M = N * HW

    # Free contiguous reshapes only — no transposes, no extra HBM passes.
    x3d = x_nchw.reshape(N, C, HW)
    g = gamma.reshape(C, 1)
    b = beta.reshape(C, 1)
    mm = moving_mean.reshape(C, 1)
    mv = moving_var.reshape(C, 1)

    t_hw = _pick_hw_tile(HW, C, x_nchw.dtype.itemsize)
    n_hw = HW // t_hw

    x_spec = pl.BlockSpec((1, C, t_hw), lambda n, h: (n, 0, h))
    cvec = lambda: pl.BlockSpec((C, 1), lambda n, h: (0, 0))  # VMEM-resident params

    if training:
        stats_kernel = functools.partial(
            _stats_kernel, eps=eps, momentum=momentum, count=float(M))
        scale, shift, new_mm, new_mv = pl.pallas_call(
            stats_kernel,
            grid=(N, n_hw),
            in_specs=[x_spec, cvec(), cvec(), cvec(), cvec()],
            out_specs=(cvec(), cvec(), cvec(), cvec()),
            out_shape=(
                jax.ShapeDtypeStruct((C, 1), jnp.float32),
                jax.ShapeDtypeStruct((C, 1), jnp.float32),
                jax.ShapeDtypeStruct((C, 1), moving_mean.dtype),
                jax.ShapeDtypeStruct((C, 1), moving_var.dtype),
            ),
            scratch_shapes=[pltpu.VMEM((C, 1), jnp.float32),
                            pltpu.VMEM((C, 1), jnp.float32)],
            compiler_params=pltpu.CompilerParams(
                dimension_semantics=("arbitrary", "arbitrary"),
                vmem_limit_bytes=32 << 20),
        )(x3d, g, b, mm, mv)
    else:
        # Inference branch: tiny C-length math; elementwise pass below is shared.
        inv_std = lax.rsqrt(mv.astype(jnp.float32) + eps)
        scale = g.astype(jnp.float32) * inv_std
        shift = b.astype(jnp.float32) - mm.astype(jnp.float32) * scale
        new_mm, new_mv = mm, mv

    y3d = pl.pallas_call(
        _normalize_kernel,
        grid=(N, n_hw),
        in_specs=[x_spec, cvec(), cvec()],
        out_specs=pl.BlockSpec((1, C, t_hw), lambda n, h: (n, 0, h)),
        out_shape=jax.ShapeDtypeStruct((N, C, HW), x_nchw.dtype),
        compiler_params=pltpu.CompilerParams(
            dimension_semantics=("parallel", "parallel"),
            vmem_limit_bytes=32 << 20),
    )(x3d, scale, shift)

    y = y3d.reshape(N, C, H, W)
    return y, new_mm.reshape(1, C, 1, 1), new_mv.reshape(1, C, 1, 1)


# ----------------------------- reference / test -------------------------------


def _reference(x, gamma, beta, moving_mean, moving_var, eps, momentum):
    mean = x.mean(axis=(0, 2, 3), keepdims=True)
    var = ((x - mean) ** 2).mean(axis=(0, 2, 3), keepdims=True)
    x_hat = (x - mean) / jnp.sqrt(var + eps)
    y = gamma * x_hat + beta
    return (y,
            momentum * moving_mean + (1.0 - momentum) * mean,
            momentum * moving_var + (1.0 - momentum) * var)


if __name__ == "__main__":
    # Deterministic inputs matching BatchNorm(num_features=4, num_dims=4).
    N, C, H, W = 2, 4, 16, 16
    gamma = jnp.ones((1, C, 1, 1), jnp.float32)
    beta = jnp.zeros((1, C, 1, 1), jnp.float32)
    moving_mean = jnp.zeros((1, C, 1, 1), jnp.float32)
    moving_var = jnp.zeros((1, C, 1, 1), jnp.float32)

    key = jax.random.PRNGKey(0)
    x = jax.random.normal(key, (N, C, H, W), jnp.float32)

    bn = jax.jit(functools.partial(batch_norm_pallas, eps=1e-5, momentum=0.9))
    y, new_mm, new_mv = bn(x, gamma, beta, moving_mean, moving_var)
    jax.block_until_ready((y, new_mm, new_mv))

    y_ref, mm_ref, mv_ref = _reference(
        x, gamma, beta, moving_mean, moving_var, 1e-5, 0.9)
    assert jnp.allclose(y, y_ref, atol=1e-5, rtol=1e-5)
    assert jnp.allclose(new_mm, mm_ref, atol=1e-6, rtol=1e-5)
    assert jnp.allclose(new_mv, mv_ref, atol=1e-6, rtol=1e-5)

    print("KERNEL_OK")
</pallas_src>

<mosaic_0001>
module attributes {stable_mosaic.version = 11 : i64} {
  func.func @_stats_kernel(%arg0: i32, %arg1: i32, %arg2: memref<1x4x256xf32, #tpu.memory_space<vmem>>, %arg3: memref<4x1xf32, #tpu.memory_space<vmem>>, %arg4: memref<4x1xf32, #tpu.memory_space<vmem>>, %arg5: memref<4x1xf32, #tpu.memory_space<vmem>>, %arg6: memref<4x1xf32, #tpu.memory_space<vmem>>, %arg7: memref<4x1xf32, #tpu.memory_space<vmem>>, %arg8: memref<4x1xf32, #tpu.memory_space<vmem>>, %arg9: memref<4x1xf32, #tpu.memory_space<vmem>>, %arg10: memref<4x1xf32, #tpu.memory_space<vmem>>, %arg11: memref<4x1xf32, #tpu.memory_space<vmem>>, %arg12: memref<4x1xf32, #tpu.memory_space<vmem>>) attributes {dimension_semantics = [#tpu.dimension_semantics<arbitrary>, #tpu.dimension_semantics<arbitrary>], iteration_bounds = array<i64: 2, 1>, scalar_prefetch = 0 : i64, scratch_operands = 2 : i64, tpu.core_type = #tpu.core_type<tc>, window_params = [{transform_indices = @transform_0, window_bounds = array<i64: 1, 4, 256>}, {pipeline_mode = #tpu.pipeline_mode<synchronous>, transform_indices = @transform_1, window_bounds = array<i64: 4, 1>}, {pipeline_mode = #tpu.pipeline_mode<synchronous>, transform_indices = @transform_2, window_bounds = array<i64: 4, 1>}, {pipeline_mode = #tpu.pipeline_mode<synchronous>, transform_indices = @transform_3, window_bounds = array<i64: 4, 1>}, {pipeline_mode = #tpu.pipeline_mode<synchronous>, transform_indices = @transform_4, window_bounds = array<i64: 4, 1>}, {pipeline_mode = #tpu.pipeline_mode<synchronous>, transform_indices = @transform_5, window_bounds = array<i64: 4, 1>}, {pipeline_mode = #tpu.pipeline_mode<synchronous>, transform_indices = @transform_6, window_bounds = array<i64: 4, 1>}, {pipeline_mode = #tpu.pipeline_mode<synchronous>, transform_indices = @transform_7, window_bounds = array<i64: 4, 1>}, {pipeline_mode = #tpu.pipeline_mode<synchronous>, transform_indices = @transform_8, window_bounds = array<i64: 4, 1>}]} {
    %c0_i32 = arith.constant 0 : i32
    %0 = arith.cmpi eq, %arg0, %c0_i32 : i32
    %c0_i32_0 = arith.constant 0 : i32
    %1 = arith.cmpi eq, %arg1, %c0_i32_0 : i32
    %2 = arith.andi %0, %1 : i1
    %c1_i32 = arith.constant 1 : i32
    %3 = arith.cmpi eq, %arg0, %c1_i32 : i32
    %c0_i32_1 = arith.constant 0 : i32
    %4 = arith.cmpi eq, %arg1, %c0_i32_1 : i32
    %5 = arith.andi %3, %4 : i1
    %6 = arith.extui %2 : i1 to i32
    %c0_i32_2 = arith.constant 0 : i32
    %7 = arith.cmpi ne, %6, %c0_i32_2 : i32
    scf.if %7 {
      %cst_15 = arith.constant 0.000000e+00 : f32
      %23 = vector.broadcast %cst_15 : f32 to vector<4x1xf32>
      %c0_16 = arith.constant 0 : index
      %c0_17 = arith.constant 0 : index
      %24 = vector.load %arg11[%c0_16, %c0_17] : memref<4x1xf32, #tpu.memory_space<vmem>>, vector<4x1xf32>
      tpu.vector_store %arg11[%c0_16, %c0_17], %23 {strides = array<i32>} : memref<4x1xf32, #tpu.memory_space<vmem>>, vector<4x1xf32>,
      %cst_18 = arith.constant 0.000000e+00 : f32
      %25 = vector.broadcast %cst_18 : f32 to vector<4x1xf32>
      %c0_19 = arith.constant 0 : index
      %c0_20 = arith.constant 0 : index
      %26 = vector.load %arg12[%c0_19, %c0_20] : memref<4x1xf32, #tpu.memory_space<vmem>>, vector<4x1xf32>
      tpu.vector_store %arg12[%c0_19, %c0_20], %25 {strides = array<i32>} : memref<4x1xf32, #tpu.memory_space<vmem>>, vector<4x1xf32>,
    } else {
    }
    %c0 = arith.constant 0 : index
    %c0_3 = arith.constant 0 : index
    %c0_4 = arith.constant 0 : index
    %8 = vector.load %arg2[%c0, %c0_3, %c0_4] : memref<1x4x256xf32, #tpu.memory_space<vmem>>, vector<1x4x256xf32>
    %9 = vector.shape_cast %8 : vector<1x4x256xf32> to vector<4x256xf32>
    %c0_5 = arith.constant 0 : index
    %c0_6 = arith.constant 0 : index
    %10 = vector.load %arg11[%c0_5, %c0_6] : memref<4x1xf32, #tpu.memory_space<vmem>>, vector<4x1xf32>
    %cst = arith.constant dense<0.000000e+00> : vector<4xf32>
    %11 = vector.multi_reduction <add>, %9, %cst [1] : vector<4x256xf32> to vector<4xf32>
    %12 = vector.shape_cast %11 : vector<4xf32> to vector<4x1xf32>
    %13 = arith.addf %10, %12 : vector<4x1xf32>
    %c0_7 = arith.constant 0 : index
    %c0_8 = arith.constant 0 : index
    %14 = vector.load %arg11[%c0_7, %c0_8] : memref<4x1xf32, #tpu.memory_space<vmem>>, vector<4x1xf32>
    tpu.vector_store %arg11[%c0_7, %c0_8], %13 {strides = array<i32>} : memref<4x1xf32, #tpu.memory_space<vmem>>, vector<4x1xf32>,
    %c0_9 = arith.constant 0 : index
    %c0_10 = arith.constant 0 : index
    %15 = vector.load %arg12[%c0_9, %c0_10] : memref<4x1xf32, #tpu.memory_space<vmem>>, vector<4x1xf32>
    %16 = arith.mulf %9, %9 : vector<4x256xf32>
    %cst_11 = arith.constant dense<0.000000e+00> : vector<4xf32>
    %17 = vector.multi_reduction <add>, %16, %cst_11 [1] : vector<4x256xf32> to vector<4xf32>
    %18 = vector.shape_cast %17 : vector<4xf32> to vector<4x1xf32>
    %19 = arith.addf %15, %18 : vector<4x1xf32>
    %c0_12 = arith.constant 0 : index
    %c0_13 = arith.constant 0 : index
    %20 = vector.load %arg12[%c0_12, %c0_13] : memref<4x1xf32, #tpu.memory_space<vmem>>, vector<4x1xf32>
    tpu.vector_store %arg12[%c0_12, %c0_13], %19 {strides = array<i32>} : memref<4x1xf32, #tpu.memory_space<vmem>>, vector<4x1xf32>,
    %21 = arith.extui %5 : i1 to i32
    %c0_i32_14 = arith.constant 0 : i32
    %22 = arith.cmpi ne, %21, %c0_i32_14 : i32
    scf.if %22 {
      %c0_15 = arith.constant 0 : index
      %c0_16 = arith.constant 0 : index
      %23 = vector.load %arg11[%c0_15, %c0_16] : memref<4x1xf32, #tpu.memory_space<vmem>>, vector<4x1xf32>
      %cst_17 = arith.constant 0.001953125 : f32
      %24 = vector.broadcast %cst_17 : f32 to vector<4x1xf32>
      %25 = arith.mulf %23, %24 : vector<4x1xf32>
      %c0_18 = arith.constant 0 : index
      %c0_19 = arith.constant 0 : index
      %26 = vector.load %arg12[%c0_18, %c0_19] : memref<4x1xf32, #tpu.memory_space<vmem>>, vector<4x1xf32>
      %cst_20 = arith.constant 0.001953125 : f32
      %27 = vector.broadcast %cst_20 : f32 to vector<4x1xf32>
      %28 = arith.mulf %26, %27 : vector<4x1xf32>
      %29 = arith.mulf %25, %25 : vector<4x1xf32>
      %30 = arith.subf %28, %29 : vector<4x1xf32>
      %cst_21 = arith.constant 0.000000e+00 : f32
      %31 = vector.broadcast %cst_21 : f32 to vector<4x1xf32>
      %32 = arith.maximumf %30, %31 : vector<4x1xf32>
      %cst_22 = arith.constant 9.99999974E-6 : f32
      %33 = vector.broadcast %cst_22 : f32 to vector<4x1xf32>
      %34 = arith.addf %32, %33 : vector<4x1xf32>
      %35 = math.rsqrt %34 : vector<4x1xf32>
      %c0_23 = arith.constant 0 : index
      %c0_24 = arith.constant 0 : index
      %36 = vector.load %arg3[%c0_23, %c0_24] : memref<4x1xf32, #tpu.memory_space<vmem>>, vector<4x1xf32>
      %c0_25 = arith.constant 0 : index
      %c0_26 = arith.constant 0 : index
      %37 = vector.load %arg4[%c0_25, %c0_26] : memref<4x1xf32, #tpu.memory_space<vmem>>, vector<4x1xf32>
      %38 = arith.mulf %36, %35 : vector<4x1xf32>
      %39 = arith.mulf %25, %38 : vector<4x1xf32>
      %40 = arith.subf %37, %39 : vector<4x1xf32>
      %c0_27 = arith.constant 0 : index
      %c0_28 = arith.constant 0 : index
      %41 = vector.load %arg7[%c0_27, %c0_28] : memref<4x1xf32, #tpu.memory_space<vmem>>, vector<4x1xf32>
      tpu.vector_store %arg7[%c0_27, %c0_28], %38 {strides = array<i32>} : memref<4x1xf32, #tpu.memory_space<vmem>>, vector<4x1xf32>,
      %c0_29 = arith.constant 0 : index
      %c0_30 = arith.constant 0 : index
      %42 = vector.load %arg8[%c0_29, %c0_30] : memref<4x1xf32, #tpu.memory_space<vmem>>, vector<4x1xf32>
      tpu.vector_store %arg8[%c0_29, %c0_30], %40 {strides = array<i32>} : memref<4x1xf32, #tpu.memory_space<vmem>>, vector<4x1xf32>,
      %c0_31 = arith.constant 0 : index
      %c0_32 = arith.constant 0 : index
      %43 = vector.load %arg5[%c0_31, %c0_32] : memref<4x1xf32, #tpu.memory_space<vmem>>, vector<4x1xf32>
      %cst_33 = arith.constant 0.899999976 : f32
      %44 = vector.broadcast %cst_33 : f32 to vector<4x1xf32>
      %45 = arith.mulf %44, %43 : vector<4x1xf32>
      %cst_34 = arith.constant 1.000000e-01 : f32
      %46 = vector.broadcast %cst_34 : f32 to vector<4x1xf32>
      %47 = arith.mulf %46, %25 : vector<4x1xf32>
      %48 = arith.addf %45, %47 : vector<4x1xf32>
      %c0_35 = arith.constant 0 : index
      %c0_36 = arith.constant 0 : index
      %49 = vector.load %arg9[%c0_35, %c0_36] : memref<4x1xf32, #tpu.memory_space<vmem>>, vector<4x1xf32>
      tpu.vector_store %arg9[%c0_35, %c0_36], %48 {strides = array<i32>} : memref<4x1xf32, #tpu.memory_space<vmem>>, vector<4x1xf32>,
      %c0_37 = arith.constant 0 : index
      %c0_38 = arith.constant 0 : index
      %50 = vector.load %arg6[%c0_37, %c0_38] : memref<4x1xf32, #tpu.memory_space<vmem>>, vector<4x1xf32>
      %cst_39 = arith.constant 0.899999976 : f32
      %51 = vector.broadcast %cst_39 : f32 to vector<4x1xf32>
      %52 = arith.mulf %51, %50 : vector<4x1xf32>
      %cst_40 = arith.constant 1.000000e-01 : f32
      %53 = vector.broadcast %cst_40 : f32 to vector<4x1xf32>
      %54 = arith.mulf %53, %32 : vector<4x1xf32>
      %55 = arith.addf %52, %54 : vector<4x1xf32>
      %c0_41 = arith.constant 0 : index
      %c0_42 = arith.constant 0 : index
      %56 = vector.load %arg10[%c0_41, %c0_42] : memref<4x1xf32, #tpu.memory_space<vmem>>, vector<4x1xf32>
      tpu.vector_store %arg10[%c0_41, %c0_42], %55 {strides = array<i32>} : memref<4x1xf32, #tpu.memory_space<vmem>>, vector<4x1xf32>,
    } else {
    }
    return
  }
  func.func @transform_0(%arg0: i32, %arg1: i32) -> (i32, i32, i32) {
    %c0_i32 = arith.constant 0 : i32
    %c0_i32_0 = arith.constant 0 : i32
    return %arg0, %c0_i32, %arg1 : i32, i32, i32
  }
  func.func @transform_1(%arg0: i32, %arg1: i32) -> (i32, i32) {
    %c0_i32 = arith.constant 0 : i32
    %c0_i32_0 = arith.constant 0 : i32
    %c0_i32_1 = arith.constant 0 : i32
    return %c0_i32, %c0_i32_0 : i32, i32
  }
  func.func @transform_2(%arg0: i32, %arg1: i32) -> (i32, i32) {
    %c0_i32 = arith.constant 0 : i32
    %c0_i32_0 = arith.constant 0 : i32
    %c0_i32_1 = arith.constant 0 : i32
    return %c0_i32, %c0_i32_0 : i32, i32
  }
  func.func @transform_3(%arg0: i32, %arg1: i32) -> (i32, i32) {
    %c0_i32 = arith.constant 0 : i32
    %c0_i32_0 = arith.constant 0 : i32
    %c0_i32_1 = arith.constant 0 : i32
    return %c0_i32, %c0_i32_0 : i32, i32
  }
  func.func @transform_4(%arg0: i32, %arg1: i32) -> (i32, i32) {
    %c0_i32 = arith.constant 0 : i32
    %c0_i32_0 = arith.constant 0 : i32
    %c0_i32_1 = arith.constant 0 : i32
    return %c0_i32, %c0_i32_0 : i32, i32
  }
  func.func @transform_5(%arg0: i32, %arg1: i32) -> (i32, i32) {
    %c0_i32 = arith.constant 0 : i32
    %c0_i32_0 = arith.constant 0 : i32
    %c0_i32_1 = arith.constant 0 : i32
    return %c0_i32, %c0_i32_0 : i32, i32
  }
  func.func @transform_6(%arg0: i32, %arg1: i32) -> (i32, i32) {
    %c0_i32 = arith.constant 0 : i32
    %c0_i32_0 = arith.constant 0 : i32
    %c0_i32_1 = arith.constant 0 : i32
    return %c0_i32, %c0_i32_0 : i32, i32
  }
  func.func @transform_7(%arg0: i32, %arg1: i32) -> (i32, i32) {
    %c0_i32 = arith.constant 0 : i32
    %c0_i32_0 = arith.constant 0 : i32
    %c0_i32_1 = arith.constant 0 : i32
    return %c0_i32, %c0_i32_0 : i32, i32
  }
  func.func @transform_8(%arg0: i32, %arg1: i32) -> (i32, i32) {
    %c0_i32 = arith.constant 0 : i32
    %c0_i32_0 = arith.constant 0 : i32
    %c0_i32_1 = arith.constant 0 : i32
    return %c0_i32, %c0_i32_0 : i32, i32
  }
}

module attributes {stable_mosaic.version = 11 : i64} {
  func.func @_normalize_kernel(%arg0: i32, %arg1: i32, %arg2: memref<1x4x256xf32, #tpu.memory_space<vmem>>, %arg3: memref<4x1xf32, #tpu.memory_space<vmem>>, %arg4: memref<4x1xf32, #tpu.memory_space<vmem>>, %arg5: memref<1x4x256xf32, #tpu.memory_space<vmem>>) attributes {dimension_semantics = [#tpu.dimension_semantics<parallel>, #tpu.dimension_semantics<parallel>], iteration_bounds = array<i64: 2, 1>, scalar_prefetch = 0 : i64, scratch_operands = 0 : i64, tpu.core_type = #tpu.core_type<tc>, window_params = [{transform_indices = @transform_0, window_bounds = array<i64: 1, 4, 256>}, {pipeline_mode = #tpu.pipeline_mode<synchronous>, transform_indices = @transform_1, window_bounds = array<i64: 4, 1>}, {pipeline_mode = #tpu.pipeline_mode<synchronous>, transform_indices = @transform_2, window_bounds = array<i64: 4, 1>}, {transform_indices = @transform_3, window_bounds = array<i64: 1, 4, 256>}]} {
    %c0 = arith.constant 0 : index
    %c0_0 = arith.constant 0 : index
    %c0_1 = arith.constant 0 : index
    %0 = vector.load %arg2[%c0, %c0_0, %c0_1] : memref<1x4x256xf32, #tpu.memory_space<vmem>>, vector<1x4x256xf32>
    %1 = vector.shape_cast %0 : vector<1x4x256xf32> to vector<4x256xf32>
    %c0_2 = arith.constant 0 : index
    %c0_3 = arith.constant 0 : index
    %2 = vector.load %arg3[%c0_2, %c0_3] : memref<4x1xf32, #tpu.memory_space<vmem>>, vector<4x1xf32>
    %3 = vector.broadcast %2 : vector<4x1xf32> to vector<4x256xf32>
    %4 = arith.mulf %1, %3 : vector<4x256xf32>
    %c0_4 = arith.constant 0 : index
    %c0_5 = arith.constant 0 : index
    %5 = vector.load %arg4[%c0_4, %c0_5] : memref<4x1xf32, #tpu.memory_space<vmem>>, vector<4x1xf32>
    %6 = vector.broadcast %5 : vector<4x1xf32> to vector<4x256xf32>
    %7 = arith.addf %4, %6 : vector<4x256xf32>
    %c0_6 = arith.constant 0 : index
    %c0_7 = arith.constant 0 : index
    %c0_8 = arith.constant 0 : index
    %8 = vector.load %arg5[%c0_6, %c0_7, %c0_8] : memref<1x4x256xf32, #tpu.memory_space<vmem>>, vector<1x4x256xf32>
    %9 = vector.shape_cast %8 : vector<1x4x256xf32> to vector<4x256xf32>
    %10 = vector.shape_cast %7 : vector<4x256xf32> to vector<1x4x256xf32>
    tpu.vector_store %arg5[%c0_6, %c0_7, %c0_8], %10 {strides = array<i32>} : memref<1x4x256xf32, #tpu.memory_space<vmem>>, vector<1x4x256xf32>,
    return
  }
  func.func @transform_0(%arg0: i32, %arg1: i32) -> (i32, i32, i32) {
    %c0_i32 = arith.constant 0 : i32
    %c0_i32_0 = arith.constant 0 : i32
    return %arg0, %c0_i32, %arg1 : i32, i32, i32
  }
  func.func @transform_1(%arg0: i32, %arg1: i32) -> (i32, i32) {
    %c0_i32 = arith.constant 0 : i32
    %c0_i32_0 = arith.constant 0 : i32
    %c0_i32_1 = arith.constant 0 : i32
    return %c0_i32, %c0_i32_0 : i32, i32
  }
  func.func @transform_2(%arg0: i32, %arg1: i32) -> (i32, i32) {
    %c0_i32 = arith.constant 0 : i32
    %c0_i32_0 = arith.constant 0 : i32
    %c0_i32_1 = arith.constant 0 : i32
    return %c0_i32, %c0_i32_0 : i32, i32
  }
  func.func @transform_3(%arg0: i32, %arg1: i32) -> (i32, i32, i32) {
    %c0_i32 = arith.constant 0 : i32
    %c0_i32_0 = arith.constant 0 : i32
    return %arg0, %c0_i32, %arg1 : i32, i32, i32
  }
}

</mosaic_0001>

<bundles_post_ra>
// kernel: batch_norm_pallas.3
= control target key start
LH: loop header
LB: loop body
LE: loop exit
PB: predicated region body
PF: predicated region fallthrough
CT: control target
= control target key end

     0   :  { %s413_s12 = smov 0   ;;  %s415_s13 = smov 0   ;;  %s452_s0 = inlined_call_operand.vmem [shape: f32[2,4,256], index: 0, kind: input, shape index: {}]   ;;  %s453_s1 = inlined_call_operand.vmem [shape: f32[4,1], index: 1, kind: input, shape index: {}]   ;;  %s454_s2 = inlined_call_operand.vmem [shape: f32[4,1], index: 2, kind: input, shape index: {}]   ;;  %s455_s3 = inlined_call_operand.vmem [shape: f32[2,4,256], index: 3, kind: output, shape index: {}]  }
   0x1   :  { %s417_s14 = smov 0  }
   0x2 LB: > { %s25_s15 = sadd.s32 1, %s385_s13  ;;  %p331_p0 = scmp.ge.s32.totalorder %s389_s14, 1  ;;  %s389_s14 = sphi %s417_s14, %s13_s14   ;;  %s385_s13 = sphi %s415_s13, %s457_s13   ;;  %s381_s12 = sphi %s413_s12, %s456_s12  }
   0x3   : > { %p27_p1 = scmp.ge.s32.totalorder %s25_s15, 2  ;;  %p158_p2 = scmp.lt.s32.totalorder %s389_s14, 3 }
   0x5   : > { %s459_s15 = smov (%p27_p1, %s25_s15), 0  ;;  %p159_p3 = pnand %p331_p0, %p158_p2 }
   0x6   : > { %p191_p4 = scmp.lt.s32.totalorder (!%p159_p3), %s381_s12, 1 }
   0x7   : > { %162 = sbr.rel (%p159_p3) target bundleno = 147 (0x93), region = 32 }
   0xc   : > { %v211_v0 = vld [vmem:[%s453_s1] sm:$0xf]  ;;  %v391_v1 = vmov 0   ;;  %v392_v3 = vmov 839922192   ;;  %v219_v5 = vlaneseq  ;;  %s461_s12 = smov (!%p191_p4, %s381_s12), 1 }
   0xd   : > { %366 = vset.pattern.permute.xlu0 %v391_v1  ;;  %v225_v2 = vld [vmem:[%s454_s2] sm:$0xf]  ;;  %v217_v4 = vunpack.c.l.s4 %v392_v3  ;;  %s338_s20 = sshll.u32 %s461_s12, 3 }
   0xe   : > { %214 = vperm.xlu0 %366, %v211_v0   ;;  %v220_v7 = vshrl.u32 %v219_v5, 7  ;;  %s198_s23 = scalar_lea.vmem %s452_s0, %s338_s20  ;;  %s208_s26 = scalar_lea.vmem %s455_s3, %s338_s20 }
   0xf   : > { %v218_v6 = vunpack.c.0.s8 %v217_v4  ;;  %v210_v11 = vld [vmem:[%s198_s23] sm:$0xff] }
  0x11   : > { %v221_v8 = vsub.s32 %v218_v6, %v220_v7 }
  0x12   : > { %228 = vperm.xlu0 %366, %v225_v2  }
  0x89   : > { %v215_v9 = vpop.permute.xlu0 %214 }
  0x8a   : > { %v222_v10 = vrot.slane %v215_v9, %v221_v8 }
  0x8c   : > { %v224_v13 = vmul.f32 %v222_v10, %v210_v11 }
  0x8d   : > { %v229_v12 = vpop.permute.xlu0 %228 }
  0x8e   : > { %v236_v14 = vrot.slane %v229_v12, %v221_v8 }
  0x90   : > { %v238_v15 = vadd.f32 %v236_v14, %v224_v13 }
  0x92   : > { %239 = vst [vmem:[%s208_s26] sm:$0xff] %v238_v15 }
  0x93 PF: > { %s13_s14 = sadd.s32 1, %s389_s14   ;;  %s456_s12 = smov %s385_s13 }
  0x94   : > { %p10_p5 = scmp.ge.s32.totalorder %s13_s14, 4   ;;  %s457_s13 = smov %s459_s15 }
  0x96   :  { %12 = sbr.rel (!%p10_p5) target bundleno = 2 (0x2), region = 62 }

// kernel: batch_norm_pallas.2
= control target key start
LH: loop header
LB: loop body
LE: loop exit
PB: predicated region body
PF: predicated region fallthrough
CT: control target
= control target key end

     0   :  { %s548_s27 = smov 0   ;;  %s550_s28 = smov 0   ;;  %s616_s0 = inlined_call_operand.vmem [shape: f32[2,4,256], index: 0, kind: input, shape index: {}]   ;;  %s617_s1 = inlined_call_operand.vmem [shape: f32[4,1], index: 1, kind: input, shape index: {}]   ;;  %s618_s2 = inlined_call_operand.vmem [shape: f32[4,1], index: 2, kind: input, shape index: {}]   ;;  %s619_s3 = inlined_call_operand.vmem [shape: f32[4,1], index: 3, kind: input, shape index: {}]   ;;  %s620_s4 = inlined_call_operand.vmem [shape: f32[4,1], index: 4, kind: input, shape index: {}]   ;;  %s621_s5 = inlined_call_operand.vmem [shape: f32[4,1], index: 5, kind: output, shape index: {0}]   ;;  %s622_s6 = inlined_call_operand.vmem [shape: f32[4,1], index: 6, kind: output, shape index: {1}]   ;;  %s623_s7 = inlined_call_operand.vmem [shape: f32[4,1], index: 7, kind: output, shape index: {2}]   ;;  %s624_s8 = inlined_call_operand.vmem [shape: f32[4,1], index: 8, kind: output, shape index: {3}]  }
   0x1   :  { %s552_s29 = smov 0  }
   0x2 LB: > { %s31_s30 = sadd.s32 1, %s496_s28  ;;  %p440_p0 = scmp.ge.s32.totalorder %s500_s29, 1  ;;  %s500_s29 = sphi %s552_s29, %s19_s29   ;;  %s496_s28 = sphi %s550_s28, %s626_s28   ;;  %s492_s27 = sphi %s548_s27, %s625_s27  }
   0x3   : > { %p33_p1 = scmp.ge.s32.totalorder %s31_s30, 2  ;;  %p268_p2 = scmp.lt.s32.totalorder %s500_s29, 3 }
   0x5   : > { %s628_s30 = smov (%p33_p1, %s31_s30), 0  ;;  %p269_p3 = pnand %p440_p0, %p268_p2 }
   0x6   : > { %p302_p4 = scmp.lt.s32.totalorder (!%p269_p3), %s492_s27, 1  ;;  %p311_p5 = scmp.eq.s32.totalorder (!%p269_p3), %s492_s27, 0 }
   0x7   : > { %272 = sbr.rel (%p269_p3) target bundleno = 205 (0xcd), region = 40  ;;  %p315_p6 = scmp.eq.s32.totalorder (!%p269_p3), %s492_s27, 1 }
   0xc   : > { %s303_s9 = scalar_select %p302_p4, %s492_s27, 1  ;;  %vm320_vm0 = vcmask (%p311_p5), 3072   ;;  %v502_v0 = vmov (%p311_p5), 0.0  }
   0xd   : > { %319 = sbr.rel (!%p311_p5) target bundleno = 18 (0x12), region = 44  ;;  %321 = vst.msk [vmem:[#allocation2] sm:$0xf] (%p311_p5), %vm320_vm0, %v502_v0  ;;  %322 = vst.msk [vmem:[#allocation3] sm:$0xf] (%p311_p5), %vm320_vm0, %v502_v0 }
   0xe   : > { %s447_s10 = sshll.u32 %s303_s9, 3 }
   0xf   : > { %s309_s13 = scalar_lea.vmem %s616_s0, %s447_s10 }
  0x12 PF: > { %v323_v1 = vld [vmem:[%s309_s13] sm:$0xff]  ;;  %vm328_vm1 = vcmask 1043456   ;;  %vm335_vm2 = vcmask 3072  }
  0x13   : > { %v326_v2 = vcombine.high %v323_v1, %v323_v1  ;;  %v329_v3 = vsel %vm328_vm1, %v323_v1, 0.0  ;;  %v338_v4 = vmul.f32 %v323_v1, %v323_v1  ;;  %v367_v21 = vld [vmem:[%s619_s3] sm:$0xf] (%p315_p6) }
  0x14   : > { %v324_v11 = vld [vmem:[#allocation2] sm:$0xf]  ;;  %v337_v14 = vld [vmem:[#allocation3] sm:$0xf]  ;;  %v368_v22 = vmul.f32 (%p315_p6), 0.9, %v367_v21 }
  0x15   : > { %v330_v5 = vsel %vm328_vm1, %v326_v2, 0.0  ;;  %v340_v6 = vcombine.high %v338_v4, %v338_v4  ;;  %v342_v7 = vsel %vm328_vm1, %v338_v4, 0.0  ;;  %v372_v25 = vld [vmem:[%s620_s4] sm:$0xf] (%p315_p6) }
  0x16   : > { %v331_v8 = vadd.f32 %v330_v5, %v329_v3  ;;  %v373_v29 = vmul.f32 (%p315_p6), 0.9, %v372_v25  ;;  %v360_v33 = vld [vmem:[%s617_s1] sm:$0xf] (%p315_p6) }
  0x17   : > { %v343_v9 = vsel %vm328_vm1, %v340_v6, 0.0  ;;  %v361_v36 = vld [vmem:[%s618_s2] sm:$0xf] (%p315_p6) }
  0x18   : > { %332 = vadd.xlane.f32.xlu0 %v331_v8  ;;  %v344_v10 = vadd.f32 %v343_v9, %v342_v7 }
  0x1c   : > { %345 = vadd.xlane.f32.xlu0 %v344_v10 }
  0xa1   : > { %v333_v12 = vpop.xlane.xlu0 %332 }
  0xa2   : > { %v334_v13 = vadd.f32 %v333_v12, %v324_v11 }
  0xa4   : > { %336 = vst.msk [vmem:[#allocation2] sm:$0xf] %vm335_vm2, %v334_v13  ;;  %350 = sbr.rel (!%p315_p6) target bundleno = 205 (0xcd), region = 48 }
  0xa5   : > { %v346_v15 = vpop.xlane.xlu0 %345 }
  0xa6   : > { %v347_v16 = vadd.f32 %v346_v15, %v337_v14 }
  0xa8   : > { %348 = vst.msk [vmem:[#allocation3] sm:$0xf] %vm335_vm2, %v347_v16 }
  0xab   : > { %v351_v17 = vld [vmem:[#allocation2] sm:$0xf] }
  0xac   : > { %v352_v19 = vmul.f32 0.001953125, %v351_v17 }
  0xae   : > { %v355_v23 = vmul.f32 %v352_v19, %v352_v19  ;;  %v369_v24 = vmul.f32 0.1, %v352_v19 }
  0xaf   : > { %v353_v18 = vld [vmem:[#allocation3] sm:$0xf] }
  0xb0   : > { %v354_v20 = vmul.f32 0.001953125, %v353_v18  ;;  %v370_v27 = vadd.f32 %v369_v24, %v368_v22 }
  0xb2   : > { %v356_v26 = vsub.f32 %v354_v20, %v355_v23  ;;  %371 = vst.msk [vmem:[%s623_s7] sm:$0xf] %vm335_vm2, %v370_v27 }
  0xb4   : > { %v357_v28 = vmax.f32 %v356_v26, 0.0 }
  0xb6   : > { %v358_v30 = vadd.f32 1e-05, %v357_v28  ;;  %v374_v31 = vmul.f32 0.1, %v357_v28 }
  0xb8   : > { %476 = vrsqrt.f32 %v358_v30  ;;  %v375_v32 = vadd.f32 %v374_v31, %v373_v29 }
  0xba   : > { %376 = vst.msk [vmem:[%s624_s8] sm:$0xf] %vm335_vm2, %v375_v32 }
  0xc5   : > { %v477_v34 = vpop.eup %476 }
  0xc6   : > { %v362_v35 = vmul.f32 %v477_v34, %v360_v33 }
  0xc8   : > { %365 = vst.msk [vmem:[%s621_s5] sm:$0xf] %vm335_vm2, %v362_v35  ;;  %v363_v37 = vmul.f32 %v362_v35, %v352_v19 }
  0xca   : > { %v364_v38 = vsub.f32 %v361_v36, %v363_v37 }
  0xcc   : > { %366 = vst.msk [vmem:[%s622_s6] sm:$0xf] %vm335_vm2, %v364_v38 }
  0xcd PF: > { %s19_s29 = sadd.s32 1, %s500_s29   ;;  %s625_s27 = smov %s496_s28 }
  0xce   : > { %p16_p7 = scmp.ge.s32.totalorder %s19_s29, 4   ;;  %s626_s28 = smov %s628_s30 }
  0xd0   :  { %18 = sbr.rel (!%p16_p7) target bundleno = 2 (0x2), region = 98 }

</bundles_post_ra>
